<compile_context>
chip_gen: v7x
topology: tpu7x:2x2x1
jax: 0.10.0
libtpu: 0.0.40
codegen_flags: <defaults>
</compile_context>

<pallas_src>
import numpy as np

import jax
import jax.numpy as jnp
from jax.experimental import pallas as pl
from jax.experimental.pallas import tpu as pltpu


def _make_contract_kernel(s, W, WW, split_f32):
    """Kernel over one (batch, row-tile) block.

    x_ref:   (1, TR, s*W)      input rows (r = ci*HH + hh), lanes = s1*W + w
    sel_ref: (W, s*WW)         0/1 gather matrix, sel[w, s2*WW+ww] = [w == ww*s+s2]
    o_ref:   (1, s*s, TR, WW)  per-phase output blocks, phase j = s1*s + s2
    """

    def kernel(x_ref, sel_ref, o_ref):
        sel = sel_ref[...]                               # resident constant
        for s1 in range(s):                              # static unroll: s slabs
            # Contiguous lane slice selects the s1 slab (no strided access).
            slab = x_ref[0, :, s1 * W:(s1 + 1) * W]      # (TR, W)
            if split_f32:
                # Exact f32 permute: 3-way bf16 split, each dot = 1 MXU pass.
                c0 = slab.astype(jnp.bfloat16)
                r1 = slab - c0.astype(jnp.float32)
                c1 = r1.astype(jnp.bfloat16)
                c2 = (r1 - c1.astype(jnp.float32)).astype(jnp.bfloat16)
                y = (jnp.dot(c0, sel, preferred_element_type=jnp.float32)
                     + jnp.dot(c1, sel, preferred_element_type=jnp.float32)
                     + jnp.dot(c2, sel, preferred_element_type=jnp.float32))
            else:
                # bf16 (etc.): single pass is exact (0/1 sel, f32 accumulate).
                y = jnp.dot(slab, sel, preferred_element_type=jnp.float32)
            for s2 in range(s):                          # static unroll: s phases
                o_ref[0, s1 * s + s2, :, :] = (
                    y[:, s2 * WW:(s2 + 1) * WW].astype(o_ref.dtype))

    return kernel


def _pick_row_tile(R, bytes_per_row, budget_bytes):
    """Largest row tile that fits the VMEM budget, divides R, and is a
    multiple of 8 (sublane tile) unless it equals R."""
    cap = max(1, budget_bytes // max(bytes_per_row, 1))
    if R <= cap:
        return R
    best = 0
    for cand in range(8, min(R, cap) + 1, 8):
        if R % cand == 0:
            best = cand
    if best:
        return best
    for cand in range(min(R, cap), 0, -1):               # fallback: R not /8
        if R % cand == 0:
            return cand
    return R


def contract_pallas(x, gain=2):
    """Contract forward. x: (N, C, H, W) -> (N, C*s*s, H//s, W//s)."""
    N, C, H, W = x.shape
    s = int(gain)
    assert H % s == 0 and W % s == 0, (H, W, s)
    HH, WW = H // s, W // s
    R = C * HH

    # Free (contiguous) reshape: (N, C, HH, s, W) -> (N, C*HH, s*W).
    #   x2[b, ci*HH + hh, s1*W + w] == x[b, ci, hh*s + s1, w]
    x2 = x.reshape(N, R, s * W)

    # Shared 0/1 lane-gather matrix (all s2 phases fused along columns):
    #   sel[w, s2*WW + ww] = 1  iff  w == ww*s + s2.   Size: W * (s*WW) = W*W.
    sel_np = np.zeros((W, s * WW), dtype=np.float32)
    for s2 in range(s):
        for ww in range(WW):
            sel_np[ww * s + s2, s2 * WW + ww] = 1.0

    split_f32 = (x.dtype == jnp.float32)
    sel_dtype = jnp.bfloat16 if (split_f32 or x.dtype == jnp.bfloat16) else x.dtype
    sel = jnp.asarray(sel_np, dtype=sel_dtype)

    # Per-chip VMEM budget -> row tile (TR).  Working set per grid step is
    # ~2 x (input TR*s*W + output s*s*TR*WW) * itemsize (double-buffered),
    # plus the resident sel.
    itemsize = jnp.dtype(x.dtype).itemsize
    try:
        vmem_cap = pltpu.get_tpu_info().vmem_capacity_bytes
    except Exception:
        vmem_cap = 64 << 20                               # assume smallest (v7x)
    vmem_limit = int(min(vmem_cap * 3 // 4, 96 << 20))
    sel_bytes = int(sel.size) * jnp.dtype(sel_dtype).itemsize
    budget = max(min(vmem_limit // 2, 28 << 20) - sel_bytes, 1 << 20)
    bytes_per_row = 2 * (s * W + s * s * WW) * itemsize   # double-buffered in+out
    TR = _pick_row_tile(R, bytes_per_row, budget)

    out2 = pl.pallas_call(
        _make_contract_kernel(s, W, WW, split_f32),
        out_shape=jax.ShapeDtypeStruct((N, s * s, R, WW), x.dtype),
        grid_spec=pltpu.PrefetchScalarGridSpec(
            num_scalar_prefetch=0,
            grid=(N, R // TR),
            in_specs=[
                pl.BlockSpec((1, TR, s * W), lambda n, r: (n, r, 0)),
                pl.BlockSpec((W, s * WW), lambda n, r: (0, 0)),  # resident const
            ],
            out_specs=pl.BlockSpec((1, s * s, TR, WW), lambda n, r: (n, 0, r, 0)),
        ),
        compiler_params=pltpu.CompilerParams(
            dimension_semantics=("parallel", "parallel"),
            vmem_limit_bytes=vmem_limit),
    )(x2, sel)

    # Free (contiguous) reshape to the NCHW result layout:
    #   row block j holds channels j*C + ci, spatial (hh, ww).
    return out2.reshape(N, s * s * C, HH, WW)


def contract_reference(x, gain=2):
    """Pure-JAX mirror of the PyTorch module (for correctness checking)."""
    b, c, h, w = x.shape
    s = int(gain)
    y = x.reshape(b, c, h // s, s, w // s, s)
    y = jnp.transpose(y, (0, 3, 5, 1, 2, 4))
    return y.reshape(b, c * s * s, h // s, w // s)


if __name__ == "__main__":
    N, C, H, W = 2, 4, 16, 16
    gain = 2

    key = jax.random.PRNGKey(0)
    x = jax.random.normal(key, (N, C, H, W), jnp.float32)

    out = jax.block_until_ready(contract_pallas(x, gain=gain))
    ref = jax.block_until_ready(contract_reference(x, gain=gain))

    assert out.shape == (N, C * gain * gain, H // gain, W // gain), out.shape
    assert jnp.allclose(out, ref, atol=1e-6, rtol=0.0), (
        float(jnp.max(jnp.abs(out - ref))))

    print("KERNEL_OK")
</pallas_src>

<mosaic_0001>
module attributes {stable_mosaic.version = 11 : i64} {
  func.func @kernel(%arg0: i32, %arg1: i32, %arg2: memref<1x32x32xf32, #tpu.memory_space<vmem>>, %arg3: memref<16x16xbf16, #tpu.memory_space<vmem>>, %arg4: memref<1x4x32x8xf32, #tpu.memory_space<vmem>>) attributes {dimension_semantics = [#tpu.dimension_semantics<parallel>, #tpu.dimension_semantics<parallel>], iteration_bounds = array<i64: 2, 1>, scalar_prefetch = 0 : i64, scratch_operands = 0 : i64, tpu.core_type = #tpu.core_type<tc>, window_params = [{transform_indices = @transform_0, window_bounds = array<i64: 1, 32, 32>}, {pipeline_mode = #tpu.pipeline_mode<synchronous>, transform_indices = @transform_1, window_bounds = array<i64: 16, 16>}, {transform_indices = @transform_2, window_bounds = array<i64: 1, 4, 32, 8>}]} {
    %c0 = arith.constant 0 : index
    %c0_0 = arith.constant 0 : index
    %0 = vector.load %arg3[%c0, %c0_0] : memref<16x16xbf16, #tpu.memory_space<vmem>>, vector<16x16xbf16>
    %c0_1 = arith.constant 0 : index
    %c0_2 = arith.constant 0 : index
    %c0_3 = arith.constant 0 : index
    %1 = vector.load %arg2[%c0_1, %c0_2, %c0_3] : memref<1x32x32xf32, #tpu.memory_space<vmem>>, vector<1x32x16xf32>
    %2 = vector.shape_cast %1 : vector<1x32x16xf32> to vector<32x16xf32>
    %3 = arith.truncf %2 : vector<32x16xf32> to vector<32x16xbf16>
    %4 = arith.extf %3 : vector<32x16xbf16> to vector<32x16xf32>
    %5 = arith.subf %2, %4 : vector<32x16xf32>
    %6 = arith.truncf %5 : vector<32x16xf32> to vector<32x16xbf16>
    %7 = arith.extf %6 : vector<32x16xbf16> to vector<32x16xf32>
    %8 = arith.subf %5, %7 : vector<32x16xf32>
    %9 = arith.truncf %8 : vector<32x16xf32> to vector<32x16xbf16>
    %cst = arith.constant dense<0.000000e+00> : vector<32x16xf32>
    %10 = tpu.matmul %3, %0, %cst {dimension_numbers = #tpu.dot_dimension_numbers<[1], [0], [0], [1], [0, 0, 1, 1], [], []>} : vector<32x16xbf16>, vector<16x16xbf16>, vector<32x16xf32> -> vector<32x16xf32>
    %cst_4 = arith.constant dense<0.000000e+00> : vector<32x16xf32>
    %11 = tpu.matmul %6, %0, %cst_4 {dimension_numbers = #tpu.dot_dimension_numbers<[1], [0], [0], [1], [0, 0, 1, 1], [], []>} : vector<32x16xbf16>, vector<16x16xbf16>, vector<32x16xf32> -> vector<32x16xf32>
    %12 = arith.addf %10, %11 : vector<32x16xf32>
    %cst_5 = arith.constant dense<0.000000e+00> : vector<32x16xf32>
    %13 = tpu.matmul %9, %0, %cst_5 {dimension_numbers = #tpu.dot_dimension_numbers<[1], [0], [0], [1], [0, 0, 1, 1], [], []>} : vector<32x16xbf16>, vector<16x16xbf16>, vector<32x16xf32> -> vector<32x16xf32>
    %14 = arith.addf %12, %13 : vector<32x16xf32>
    %15 = vector.extract_strided_slice %14 {offsets = [0, 0], sizes = [32, 8], strides = [1, 1]} : vector<32x16xf32> to vector<32x8xf32>
    %c0_6 = arith.constant 0 : index
    %c0_7 = arith.constant 0 : index
    %c0_8 = arith.constant 0 : index
    %c0_9 = arith.constant 0 : index
    %16 = vector.load %arg4[%c0_6, %c0_7, %c0_8, %c0_9] : memref<1x4x32x8xf32, #tpu.memory_space<vmem>>, vector<1x1x32x8xf32>
    %17 = vector.shape_cast %16 : vector<1x1x32x8xf32> to vector<32x8xf32>
    %18 = vector.shape_cast %15 : vector<32x8xf32> to vector<1x1x32x8xf32>
    tpu.vector_store %arg4[%c0_6, %c0_7, %c0_8, %c0_9], %18 {strides = array<i32>} : memref<1x4x32x8xf32, #tpu.memory_space<vmem>>, vector<1x1x32x8xf32>,
    %19 = vector.extract_strided_slice %14 {offsets = [0, 8], sizes = [32, 8], strides = [1, 1]} : vector<32x16xf32> to vector<32x8xf32>
    %c0_10 = arith.constant 0 : index
    %c1 = arith.constant 1 : index
    %c0_11 = arith.constant 0 : index
    %c0_12 = arith.constant 0 : index
    %20 = vector.load %arg4[%c0_10, %c1, %c0_11, %c0_12] : memref<1x4x32x8xf32, #tpu.memory_space<vmem>>, vector<1x1x32x8xf32>
    %21 = vector.shape_cast %20 : vector<1x1x32x8xf32> to vector<32x8xf32>
    %22 = vector.shape_cast %19 : vector<32x8xf32> to vector<1x1x32x8xf32>
    tpu.vector_store %arg4[%c0_10, %c1, %c0_11, %c0_12], %22 {strides = array<i32>} : memref<1x4x32x8xf32, #tpu.memory_space<vmem>>, vector<1x1x32x8xf32>,
    %c0_13 = arith.constant 0 : index
    %c0_14 = arith.constant 0 : index
    %c16 = arith.constant 16 : index
    %23 = vector.load %arg2[%c0_13, %c0_14, %c16] : memref<1x32x32xf32, #tpu.memory_space<vmem>>, vector<1x32x16xf32>
    %24 = vector.shape_cast %23 : vector<1x32x16xf32> to vector<32x16xf32>
    %25 = arith.truncf %24 : vector<32x16xf32> to vector<32x16xbf16>
    %26 = arith.extf %25 : vector<32x16xbf16> to vector<32x16xf32>
    %27 = arith.subf %24, %26 : vector<32x16xf32>
    %28 = arith.truncf %27 : vector<32x16xf32> to vector<32x16xbf16>
    %29 = arith.extf %28 : vector<32x16xbf16> to vector<32x16xf32>
    %30 = arith.subf %27, %29 : vector<32x16xf32>
    %31 = arith.truncf %30 : vector<32x16xf32> to vector<32x16xbf16>
    %cst_15 = arith.constant dense<0.000000e+00> : vector<32x16xf32>
    %32 = tpu.matmul %25, %0, %cst_15 {dimension_numbers = #tpu.dot_dimension_numbers<[1], [0], [0], [1], [0, 0, 1, 1], [], []>} : vector<32x16xbf16>, vector<16x16xbf16>, vector<32x16xf32> -> vector<32x16xf32>
    %cst_16 = arith.constant dense<0.000000e+00> : vector<32x16xf32>
    %33 = tpu.matmul %28, %0, %cst_16 {dimension_numbers = #tpu.dot_dimension_numbers<[1], [0], [0], [1], [0, 0, 1, 1], [], []>} : vector<32x16xbf16>, vector<16x16xbf16>, vector<32x16xf32> -> vector<32x16xf32>
    %34 = arith.addf %32, %33 : vector<32x16xf32>
    %cst_17 = arith.constant dense<0.000000e+00> : vector<32x16xf32>
    %35 = tpu.matmul %31, %0, %cst_17 {dimension_numbers = #tpu.dot_dimension_numbers<[1], [0], [0], [1], [0, 0, 1, 1], [], []>} : vector<32x16xbf16>, vector<16x16xbf16>, vector<32x16xf32> -> vector<32x16xf32>
    %36 = arith.addf %34, %35 : vector<32x16xf32>
    %37 = vector.extract_strided_slice %36 {offsets = [0, 0], sizes = [32, 8], strides = [1, 1]} : vector<32x16xf32> to vector<32x8xf32>
    %c0_18 = arith.constant 0 : index
    %c2 = arith.constant 2 : index
    %c0_19 = arith.constant 0 : index
    %c0_20 = arith.constant 0 : index
    %38 = vector.load %arg4[%c0_18, %c2, %c0_19, %c0_20] : memref<1x4x32x8xf32, #tpu.memory_space<vmem>>, vector<1x1x32x8xf32>
    %39 = vector.shape_cast %38 : vector<1x1x32x8xf32> to vector<32x8xf32>
    %40 = vector.shape_cast %37 : vector<32x8xf32> to vector<1x1x32x8xf32>
    tpu.vector_store %arg4[%c0_18, %c2, %c0_19, %c0_20], %40 {strides = array<i32>} : memref<1x4x32x8xf32, #tpu.memory_space<vmem>>, vector<1x1x32x8xf32>,
    %41 = vector.extract_strided_slice %36 {offsets = [0, 8], sizes = [32, 8], strides = [1, 1]} : vector<32x16xf32> to vector<32x8xf32>
    %c0_21 = arith.constant 0 : index
    %c3 = arith.constant 3 : index
    %c0_22 = arith.constant 0 : index
    %c0_23 = arith.constant 0 : index
    %42 = vector.load %arg4[%c0_21, %c3, %c0_22, %c0_23] : memref<1x4x32x8xf32, #tpu.memory_space<vmem>>, vector<1x1x32x8xf32>
    %43 = vector.shape_cast %42 : vector<1x1x32x8xf32> to vector<32x8xf32>
    %44 = vector.shape_cast %41 : vector<32x8xf32> to vector<1x1x32x8xf32>
    tpu.vector_store %arg4[%c0_21, %c3, %c0_22, %c0_23], %44 {strides = array<i32>} : memref<1x4x32x8xf32, #tpu.memory_space<vmem>>, vector<1x1x32x8xf32>,
    return
  }
  func.func @transform_0(%arg0: i32, %arg1: i32) -> (i32, i32, i32) {
    %c0_i32 = arith.constant 0 : i32
    %c0_i32_0 = arith.constant 0 : i32
    return %arg0, %arg1, %c0_i32 : i32, i32, i32
  }
  func.func @transform_1(%arg0: i32, %arg1: i32) -> (i32, i32) {
    %c0_i32 = arith.constant 0 : i32
    %c0_i32_0 = arith.constant 0 : i32
    %c0_i32_1 = arith.constant 0 : i32
    return %c0_i32, %c0_i32_0 : i32, i32
  }
  func.func @transform_2(%arg0: i32, %arg1: i32) -> (i32, i32, i32, i32) {
    %c0_i32 = arith.constant 0 : i32
    %c0_i32_0 = arith.constant 0 : i32
    %c0_i32_1 = arith.constant 0 : i32
    return %arg0, %c0_i32, %arg1, %c0_i32_0 : i32, i32, i32, i32
  }
}

</mosaic_0001>

<bundles_post_ra>
// kernel: tpu_custom_call.1
= control target key start
LH: loop header
LB: loop body
LE: loop exit
PB: predicated region body
PF: predicated region fallthrough
CT: control target
= control target key end

     0   :  { %7 = vsyncpa [#allocation3], 0  ;;  %s1314_s0 = inlined_call_operand.hbm [shape: f32[2,32,32], index: 0, kind: input, shape index: {}]   ;;  %s1315_s1 = inlined_call_operand.hbm [shape: bf16[16,16], index: 1, kind: input, shape index: {}]   ;;  %s1316_s2 = inlined_call_operand.vmem [shape: f32[2,4,32,8], index: 2, kind: output, shape index: {}]  }
   0x1   :  { %9 = vsyncpa [#allocation3 + $0x1], 0 }
   0x2   :  { %10 = vsyncpa [#allocation5], 0  ;;  %s1104_s9 = smov 0   ;;  %s1106_s10 = smov 0  }
   0x3   :  { %s1108_s11 = smov 0   ;;  %s1110_s12 = smov 0  }
   0x4   :  { %s1112_s13 = smov 0   ;;  %s1114_s14 = smov 0  }
   0x5 LB: > { %s782_s15 = sadd.s32 4294967295, %s1079_s14   ;;  %p50_p0 = scmp.ne.s32.totalorder %s1063_s10, %s1059_s9  ;;  %s1079_s14 = sphi %s1114_s14, %s16_s14   ;;  %s1075_s13 = sphi %s1112_s13, %s1333_s13   ;;  %s1071_s12 = sphi %s1110_s12, %s1332_s12   ;;  %s1067_s11 = sphi %s1108_s11, %s1331_s11   ;;  %s1063_s10 = sphi %s1106_s10, %s1330_s10   ;;  %s1059_s9 = sphi %s1104_s9, %s1329_s9  }
   0x6   : > { %p1134_p1 = scmp.eq.s32.totalorder %s782_s15, 0  ;;  %p784_p2 = scmp.ge.s32.totalorder %s1079_s14, 1 }
   0x7   : > { %p110_p3 = scmp.lt.s32.totalorder %s1079_s14, 3  ;;  %s1081_s19 = smov [#allocation4]  }
   0x8   : > { %s1321_s16 = scalar_select %p1134_p1, 1, 0 }
   0x9   : > { %p1142_p4 = por %p1134_p1, %p50_p0  ;;  %p1146_p5 = pnand %p784_p2, %p110_p3 }
   0xa   : > { %s122_s20 = sshll.u32 %s1081_s19, 4  ;;  %s28_s22 = sadd.s32 1, %s1075_s13  ;;  %s123_s20 = int_to_ptr.vmem [resolvable:$true] %s122_s20 }
   0xb   : > { %s1322_s17 = scalar_select %p1142_p4, 1, 0 }
   0xc   : > { %s1323_s18 = scalar_select %p1146_p5, 1, 0 }
   0xd   : > { %p900_p6 = pneg %p1146_p5  ;;  %s967_s25 = scalar_lea.hbm %s1315_s1, 128 }
   0xe   : > { %p968_p8 = scmp.ne.s32.totalorder %s1315_s1, %s967_s25  ;;  %p974_p12 = scmp.lt.u32.totalorder %s967_s25, %s1315_s1 }
   0xf   : > { %p1154_p7 = pnand %p900_p6, %p1134_p1 }
  0x11   : > { %p969_p9 = pneg %p1154_p7 }
  0x13   : > { %p970_p10 = pnand %p969_p9, %p968_p8 }
  0x15   : > { %p971_p11 = pneg %p970_p10 }
  0x17   : > { %p976_p13 = pnand %p974_p12, %p971_p11 }
  0x19   : > { %979 = shalt.err (!%p976_p13)
}
  0x1a   : > { %s980_s30 = scalar_lea.vmem %s123_s20, 128  ;;  %p988_p6 = scmp.lt.s32.totalorder %s123_s20, %s123_s20 }
  0x1b   : > { %p981_p0 = scmp.ne.s32.totalorder %s123_s20, %s980_s30  ;;  %p989_p1 = scmp.lt.s32.totalorder %s980_s30, %s980_s30 }
  0x1d   : > { %p983_p2 = pnand %p981_p0, %p969_p9  ;;  %p990_p4 = por %p989_p1, %p988_p6 }
  0x1f   : > { %p984_p3 = pneg %p983_p2 }
  0x21   : > { %p991_p5 = pnand %p990_p4, %p984_p3 }
  0x23   : > { %994 = shalt.err (!%p991_p5)
}
  0x24   : > { %s1082_s3 = smov 64   ;;  %s1083_s4 = smov 4  }
  0x25   : > { %903 = dma.hbm_to_vmem [thread:$0]  (!%p1154_p7), %s1315_s1, 128, %s123_s20, [#allocation5], %s1082_s3, %s1082_s3, %s1083_s4  }
  0x26   : > { %p30_p1 = scmp.ge.s32.totalorder %s28_s22, 2  ;;  %s37_s7 = sadd.s32 1, %s1067_s11 }
  0x27   : > { %p44_p4 = scmp.ne.s32.totalorder %s1067_s11, %s1063_s10  ;;  %p45_p5 = scmp.eq.s32.totalorder %s1079_s14, 0 }
  0x28   : > { %s1335_s22 = smov (%p30_p1, %s28_s22), 0  ;;  %p909_p9 = scmp.lt.s32.totalorder %s1079_s14, 2 }
  0x29   : > { %p46_p8 = por %p45_p5, %p44_p4  ;;  %s32_s8 = ssub.s32 %s1075_s13, %s1335_s22 }
  0x2a   : > { %s136_s9 = sand.u32 1, %s1067_s11   ;;  %p35_p10 = scmp.eq.s32.totalorder %s32_s8, 0 }
  0x2b   : > { %s787_s15 = sshll.u32 %s136_s9, 5  ;;  %s822_s19 = sshll.u32 %s1075_s13, 9 }
  0x2c   : > { %s1187_s23 = scalar_select %p35_p10, %s1067_s11, %s37_s7  }
  0x2d   : > { %s1192_s20 = scalar_lea.hbm %s1314_s0, %s822_s19  ;;  %s140_s25 = scalar_lea.vmem [#allocation2], %s787_s15 }
  0x2e   : > { %s149_s26 = sshll.u32 %s140_s25, 4  ;;  %p1194_p7 = pnand %p909_p9, %p46_p8  ;;  %s1198_s26 = int_to_ptr.vmem [resolvable:$true] %s149_s26 }
  0x2f   : > { %s1200_s28 = scalar_lea.sflag [#allocation3], %s136_s9  ;;  %s995_s29 = scalar_lea.hbm %s1192_s20, 512 }
  0x30   : > { %p996_p11 = scmp.ne.s32.totalorder %s1192_s20, %s995_s29  ;;  %p997_p12 = pneg %p1194_p7 }
  0x31   : > { %s1000_s4 = scalar_lea.hbm %s1314_s0, 1024  ;;  %p1001_p2 = scmp.lt.u32.totalorder %s1192_s20, %s1314_s0 }
  0x32   : > { %p998_p13 = pnand %p997_p12, %p996_p11  ;;  %p1002_p3 = scmp.lt.u32.totalorder %s1000_s4, %s995_s29 }
  0x33   : > { %p1004_p1 = scmp.lt.u32.totalorder %s995_s29, %s1192_s20 }
  0x34   : > { %p999_p0 = pneg %p998_p13  ;;  %p1003_p6 = por %p1002_p3, %p1001_p2 }
  0x36   : > { %p1005_p4 = por %p1004_p1, %p1003_p6 }
  0x38   : > { %p1006_p5 = pnand %p1005_p4, %p999_p0 }
  0x3a   : > { %1009 = shalt.err (!%p1006_p5)
}
  0x3b   : > { %s1010_s7 = scalar_lea.vmem %s1198_s26, 512  ;;  %s1084_s8 = smov [#allocation2]  }
  0x3c   : > { %p1011_p8 = scmp.ne.s32.totalorder %s1198_s26, %s1010_s7  ;;  %s1015_s9 = sshll.u32 %s1084_s8, 4  ;;  %s1016_s9 = int_to_ptr.vmem [resolvable:$false] %s1015_s9 }
  0x3d   : > { %s1017_s15 = scalar_lea.vmem %s1016_s9, 1024  ;;  %p1018_p11 = scmp.lt.s32.totalorder %s1198_s26, %s1016_s9 }
  0x3e   : > { %p1013_p9 = pnand %p1011_p8, %p997_p12  ;;  %p1019_p13 = scmp.lt.s32.totalorder %s1017_s15, %s1010_s7 }
  0x40   : > { %p1014_p10 = pneg %p1013_p9  ;;  %p1020_p2 = por %p1019_p13, %p1018_p11 }
  0x42   : > { %p1021_p3 = pnand %p1020_p2, %p1014_p10 }
  0x44   : > { %1024 = shalt.err (!%p1021_p3)
}
  0x45   : > { %s1085_s19 = smov 128   ;;  %s1086_s21 = smov 8  }
  0x46   : > { %907 = dma.hbm_to_vmem [thread:$0]  (!%p1194_p7), %s1192_s20, 512, %s1198_s26, %s1200_s28, %s1085_s19, %s1085_s19, %s1086_s21  }
  0x47   : > { %p1326_p12 = scmp.ne.s32.totalorder %s1323_s18, 0 }
  0x48   : > { %s163_s24 = sand.u32 (!%p1326_p12), 1, %s1063_s10   ;;  %p1327_p0 = scmp.ne.s32.totalorder (!%p1326_p12), %s1322_s17, 0 }
  0x49   : > { %161 = sbr.rel (%p1326_p12) target bundleno = 571 (0x23b), region = 28  ;;  %s791_s25 = sshll.u32 (!%p1326_p12), %s163_s24, 5 }
  0x4a   : > { %s164_s29 = scalar_lea.sflag (!%p1326_p12), [#allocation3], %s163_s24  ;;  %s167_s30 = scalar_lea.vmem (!%p1326_p12), [#allocation2], %s791_s25 }
  0x50   : > { %1050 = dma.done.wait (%p1327_p0), %s164_s29, 512  }
  0x51   : > { %1052 = vsyncadd (%p1327_p0), %s164_s29, 4294966784  ;;  %p1328_p6 = scmp.ne.s32.totalorder %s1321_s16, 0 }
  0x53   : > { %1054 = dma.done.wait (%p1328_p6), [#allocation5], 128  }
  0x54   : > { %1056 = vsyncadd (%p1328_p6), [#allocation5], 4294967168  ;;  %v438_v0 = vld [vmem:[%s167_s30] sm:$0xff]  ;;  %v439_v1 = vld [vmem:[%s167_s30 + $0x8] sm:$0xff]  ;;  %s1087_s18 = smov 112   ;;  %vm242_vm0 = vcmask 130048  }
  0x55   : > { %v440_v2 = vld [vmem:[%s167_s30 + $0x10] sm:$0xff]  ;;  %v442_v3 = vpack.c.bf16 %v439_v1, %v438_v0  ;;  %v441_v4 = vld [vmem:[%s167_s30 + $0x18] sm:$0xff]  ;;  %v966_v6 = vld [vmem:[#allocation4] sm:$0xff]   ;;  %p198_p7 = scmp.lt.s32.totalorder %s1071_s12, 1  ;;  %vm412_vm1 = vcmask 64512   ;;  %s1088_s27 = smov 120  }
  0x56   : > { %v443_v5 = vpack.c.bf16 %v441_v4, %v440_v2  ;;  %842 = vmatprep.subr.bf16.mxu0 %v966_v6  ;;  %860 = vmatprep.subr.bf16.mxu1 %v966_v6 }
  0x57   : > { %v444_v7 = vunpack.c.l.bf16 %v442_v3  ;;  %v445_v8 = vunpack.c.h.bf16 %v442_v3  ;;  %527 = vrot.lane.b32.xlu1 %v442_v3, %s1087_s18  ;;  %843 = vmatpush3.bf16.msra.mxu0 %v966_v6  ;;  %s1337_s12 = smov (!%p198_p7, %s1071_s12), 1 }
  0x58   : > { %v446_v9 = vunpack.c.l.bf16 %v443_v5  ;;  %v447_v10 = vunpack.c.h.bf16 %v443_v5  ;;  %861 = vmatpush3.bf16.msra.mxu1 %v966_v6  ;;  %848 = vmatprep.subr.bf16.mxu0 %v966_v6  ;;  %s823_s16 = sshll.u32 %s1337_s12, 7 }
  0x59   : > { %v448_v11 = vsub.f32 %v438_v0, %v444_v7  ;;  %v449_v12 = vsub.f32 %v439_v1, %v445_v8  ;;  %866 = vmatprep.subr.bf16.mxu1 %v966_v6  ;;  %s1262_s26 = scalar_lea.vmem %s1316_s2, %s823_s16 }
  0x5a   : > { %v450_v13 = vsub.f32 %v440_v2, %v446_v9  ;;  %v451_v14 = vsub.f32 %v441_v4, %v447_v10 }
  0x5b   : > { %v452_v15 = vpack.c.bf16 %v449_v12, %v448_v11  ;;  %529 = vrot.lane.b32.xlu1 %v443_v5, %s1087_s18 }
  0x5c   : > { %v453_v16 = vpack.c.bf16 %v451_v14, %v450_v13 }
  0x5d   : > { %466 = vrot.lane.b32.xlu0 %v452_v15, %s1087_s18  ;;  %v454_v17 = vunpack.c.l.bf16 %v452_v15  ;;  %v455_v18 = vunpack.c.h.bf16 %v452_v15  ;;  %844 = vmatprep.mubr.msk.bf16.mxu0 %vm242_vm0, %v452_v15 }
  0x5e   : > { %v456_v19 = vunpack.c.l.bf16 %v453_v16  ;;  %v457_v20 = vunpack.c.h.bf16 %v453_v16  ;;  %845 = vmatmul.mubr.msk.bf16.vlgmr.msra.gmra.mrb[0].mxu0 %vm242_vm0, %v453_v16 }
  0x5f   : > { %v458_v21 = vsub.f32 %v448_v11, %v454_v17  ;;  %v459_v22 = vsub.f32 %v449_v12, %v455_v18  ;;  %849 = vmatpush3.bf16.msra.mxu0 %v966_v6  ;;  %850 = vmatprep.mubr.msk.bf16.mxu0 %vm242_vm0, %v442_v3 }
  0x60   : > { %v460_v23 = vsub.f32 %v450_v13, %v456_v19  ;;  %v461_v24 = vsub.f32 %v451_v14, %v457_v20  ;;  %854 = vmatprep.subr.bf16.mxu0 %v966_v6 }
  0x61   : > { %468 = vrot.lane.b32.xlu0 %v453_v16, %s1087_s18  ;;  %v462_v25 = vpack.c.bf16 %v459_v22, %v458_v21 }
  0x62   : > { %v463_v26 = vpack.c.bf16 %v461_v24, %v460_v23 }
  0x64   : > { %590 = vrot.lane.b32.xlu1 %v463_v26, %s1087_s18 }
  0x65   : > { %588 = vrot.lane.b32.xlu0 %v462_v25, %s1087_s18 }
  0x6a   : > { %851 = vmatmul.mubr.msk.bf16.vlgmr.msra.gmra.mrb[0].mxu0 %vm242_vm0, %v443_v5 }
  0x6b   : > { %855 = vmatpush3.bf16.msra.mxu0 %v966_v6  ;;  %856 = vmatprep.mubr.msk.bf16.mxu0 %vm242_vm0, %v462_v25 }
  0x76   : > { %857 = vmatmul.mubr.msk.bf16.vlgmr.msra.gmra.mrb[0].mxu0 %vm242_vm0, %v463_v26 }
  0xc9   : > { %v528_v28 = vpop.permute.xlu1 %527 }
  0xcd   : > { %v530_v30 = vpop.permute.xlu1 %529 }
  0xcf   : > { %v467_v27 = vpop.permute.xlu0 %466 }
  0xd0   : > { %862 = vmatprep.mubr.msk.bf16.mxu1 %vm242_vm0, %v467_v27 }
  0xd3   : > { %v469_v29 = vpop.permute.xlu0 %468 }
  0xd4   : > { %863 = vmatmul.mubr.msk.bf16.vlgmr.msra.gmra.mrb[0].mxu1 %vm242_vm0, %v469_v29 }
  0xd5   : > { %867 = vmatpush3.bf16.msra.mxu1 %v966_v6  ;;  %868 = vmatprep.mubr.msk.bf16.mxu1 %vm242_vm0, %v528_v28 }
  0xd6   : > { %872 = vmatprep.subr.bf16.mxu1 %v966_v6  ;;  %v591_v32 = vpop.permute.xlu1 %590 }
  0xd7   : > { %v589_v31 = vpop.permute.xlu0 %588 }
  0xe0   : > { %869 = vmatmul.mubr.msk.bf16.vlgmr.msra.gmra.mrb[0].mxu1 %vm242_vm0, %v530_v30 }
  0xe1   : > { %873 = vmatpush3.bf16.msra.mxu1 %v966_v6  ;;  %874 = vmatprep.mubr.msk.bf16.mxu1 %vm242_vm0, %v589_v31 }
  0xec   : > { %875 = vmatmul.mubr.msk.bf16.vlgmr.msra.gmra.mrb[0].mxu1 %vm242_vm0, %v591_v32 }
 0x149   : > { %v858_v33 = vpop.f32.mrb[0].mxu0 }
 0x14a   : > { %415 = vst.msk [vmem:[%s1262_s26 + $0x10] sm:$0xff] %vm412_vm1, %v858_v33  ;;  %v393_v34 = vpop.f32.mrb[1].mxu0  ;;  %425 = vrot.lane.b32.xlu0 %v858_v33, %s1088_s27 }
 0x14b   : > { %413 = vst.msk [vmem:[%s1262_s26] sm:$0xff] %vm412_vm1, %v393_v34  ;;  %v859_v35 = vpop.f32.mrb[2].mxu0 }
 0x14c   : > { %416 = vst.msk [vmem:[%s1262_s26 + $0x18] sm:$0xff] %vm412_vm1, %v859_v35  ;;  %427 = vrot.lane.b32.xlu1 %v859_v35, %s1088_s27  ;;  %v396_v36 = vpop.f32.mrb[3].mxu0 }
 0x14d   : > { %414 = vst.msk [vmem:[%s1262_s26 + $0x8] sm:$0xff] %vm412_vm1, %v396_v36 }
 0x14e   : > { %421 = vrot.lane.b32.xlu0 %v393_v34, %s1088_s27 }
 0x150   : > { %423 = vrot.lane.b32.xlu1 %v396_v36, %s1088_s27 }
 0x1bc   : > { %v426_v37 = vpop.permute.xlu0 %425 }
 0x1bd   : > { %804 = vst.msk [vmem:[%s1262_s26 + $0x30] sm:$0xff] %vm412_vm1, %v426_v37 }
 0x1be   : > { %v428_v38 = vpop.permute.xlu1 %427 }
 0x1bf   : > { %v876_v39 = vpop.f32.mrb[0].mxu1  ;;  %805 = vst.msk [vmem:[%s1262_s26 + $0x38] sm:$0xff] %vm412_vm1, %v428_v38 }
 0x1c0   : > { %814 = vst.msk [vmem:[%s1262_s26 + $0x50] sm:$0xff] %vm412_vm1, %v876_v39  ;;  %v632_v40 = vpop.f32.mrb[1].mxu1  ;;  %v422_v41 = vpop.permute.xlu0 %421 }
 0x1c1   : > { %812 = vst.msk [vmem:[%s1262_s26 + $0x40] sm:$0xff] %vm412_vm1, %v632_v40  ;;  %v877_v42 = vpop.f32.mrb[2].mxu1  ;;  %660 = vrot.lane.b32.xlu0 %v632_v40, %s1088_s27  ;;  %802 = vst.msk [vmem:[%s1262_s26 + $0x20] sm:$0xff] %vm412_vm1, %v422_v41 }
 0x1c2   : > { %815 = vst.msk [vmem:[%s1262_s26 + $0x58] sm:$0xff] %vm412_vm1, %v877_v42  ;;  %v635_v43 = vpop.f32.mrb[3].mxu1  ;;  %v424_v44 = vpop.permute.xlu1 %423 }
 0x1c3   : > { %813 = vst.msk [vmem:[%s1262_s26 + $0x48] sm:$0xff] %vm412_vm1, %v635_v43  ;;  %662 = vrot.lane.b32.xlu1 %v635_v43, %s1088_s27  ;;  %803 = vst.msk [vmem:[%s1262_s26 + $0x28] sm:$0xff] %vm412_vm1, %v424_v44 }
 0x1c5   : > { %664 = vrot.lane.b32.xlu0 %v876_v39, %s1088_s27 }
 0x1c7   : > { %666 = vrot.lane.b32.xlu1 %v877_v42, %s1088_s27 }
 0x233   : > { %v661_v45 = vpop.permute.xlu0 %660 }
 0x234   : > { %816 = vst.msk [vmem:[%s1262_s26 + $0x60] sm:$0xff] %vm412_vm1, %v661_v45 }
 0x235   : > { %v663_v46 = vpop.permute.xlu1 %662 }
 0x236   : > { %817 = vst.msk [vmem:[%s1262_s26 + $0x68] sm:$0xff] %vm412_vm1, %v663_v46 }
 0x237   : > { %v665_v47 = vpop.permute.xlu0 %664 }
 0x238   : > { %818 = vst.msk [vmem:[%s1262_s26 + $0x70] sm:$0xff] %vm412_vm1, %v665_v47 }
 0x239   : > { %v667_v48 = vpop.permute.xlu1 %666 }
 0x23a   : > { %819 = vst.msk [vmem:[%s1262_s26 + $0x78] sm:$0xff] %vm412_vm1, %v667_v48 }
 0x23b PF: > { %s16_s14 = sadd.s32 1, %s1079_s14   ;;  %s1329_s9 = smov %s1063_s10 }
 0x23c   : > { %p13_p1 = scmp.ge.s32.totalorder %s16_s14, 4   ;;  %s1330_s10 = smov %s1067_s11 }
 0x23d   : > { %s1331_s11 = smov %s1187_s23  ;;  %s1332_s12 = smov %s1075_s13 }
 0x23e   : > { %s1333_s13 = smov %s1335_s22  ;;  %15 = sbr.rel (!%p13_p1) target bundleno = 5 (0x5), region = 75 }
 0x245   :  { %707 = vsyncpa [#allocation3], 1 }
 0x246   :  { %709 = vsyncpa [#allocation3 + $0x1], 1 }
 0x247   :  { %710 = vsyncpa [#allocation5], 1 }

</bundles_post_ra>
